<compile_context>
chip_gen: v6e
topology: v6e:2x2x1
jax: 0.10.0
libtpu: 0.0.40
codegen_flags: <defaults>
</compile_context>

<pallas_src>
import functools
import math

import jax
import jax.numpy as jnp
from jax.experimental import pallas as pl
from jax.experimental.pallas import tpu as pltpu


def _round_up(a: int, b: int) -> int:
    return (a + b - 1) // b * b


@functools.lru_cache(maxsize=1)
def _chip_info():
    """Returns (per-core VMEM bytes, TensorCores per chip) with safe fallbacks."""
    vmem = 64 * 1024 * 1024  # conservative default (v7x per-core VMEM)
    try:
        vmem = int(pltpu.get_tpu_info().vmem_capacity_bytes)
    except Exception:
        pass
    # Heuristic: only v7x has <= 64 MiB per-core VMEM, and it has 2 TensorCores.
    cores = 2 if vmem <= 64 * 1024 * 1024 else 1
    return vmem, cores


def _spec(shape, index_map, buffers=None):
    """BlockSpec with an optional explicit buffer count (graceful fallback)."""
    if buffers is not None:
        try:
            return pl.BlockSpec(shape, index_map, pipeline_mode=pl.Buffered(buffers))
        except (TypeError, AttributeError):
            pass
    return pl.BlockSpec(shape, index_map)


def linear_add_kernel(x_ref, wt_ref, o_ref):
    # v1 = x @ Wt   (MXU, f32 accumulation)
    # v2 = v1 + x   (VPU, fused while the tile is resident in VMEM)
    x = x_ref[...]
    acc = jnp.dot(x, wt_ref[...], preferred_element_type=jnp.float32)
    acc = acc + x.astype(jnp.float32)  # residual in f32, deliberate
    o_ref[...] = acc.astype(o_ref.dtype)


def prepare_weight(w):
    """One-time prep: PyTorch-layout (out_features, in_features) -> (in, out).

    Hoisted out of the per-call jitted path so repeated inference does not pay
    for a transpose kernel on every call.
    """
    return jnp.asarray(w).T


def _pick_tm(M, K, N, itemsize, sub, budget, min_tiles, nbuf):
    """Largest row tile (multiple of the sublane pack, <= 512) fitting the budget."""
    if M <= sub:
        return M  # single full-extent block (always a legal BlockSpec)

    def working_set(t):
        # nbuf x-tiles + nbuf out-tiles + (double-buffered) resident weight
        # + the in-kernel f32 accumulator temporary.
        return (nbuf * t * K + nbuf * t * N + 2 * K * N) * itemsize + t * N * 4

    tm = min(_round_up(M, sub), 512)
    while tm > sub and working_set(tm) > budget:
        tm = _round_up(max(tm // 2, sub), sub)

    # Multi-TensorCore chips (v7x): ensure the "parallel" axis has enough tiles to
    # shard across cores; neutral on single-core chips (min_tiles == 1).
    if min_tiles > 1:
        cap = _round_up(pl.cdiv(M, min_tiles), sub)
        tm = max(min(tm, cap), sub)
    return tm


@jax.jit
def linear_add(x, wt):
    """y = x @ wt + x.   x: (M, K);  wt: weight already in (in_features, out_features)."""
    M, K = x.shape
    Kw, N = wt.shape
    assert K == Kw, "weight in_features must match x features"
    assert K == N, "residual add requires in_features == out_features"

    itemsize = jnp.dtype(x.dtype).itemsize
    sub = max(8, 32 // itemsize)          # dtype-aware sublane pack (8 / 16 / 32)

    vmem_cap, num_tc = _chip_info()
    budget = (vmem_cap * 3) // 4          # ~48 MiB on v7x, ~96 MiB on v5e/v6e

    # Triple-buffer x/out only for long grids (DMA-latency dominated pipeline).
    nbuf_guess = 3 if pl.cdiv(M, 512) >= 16 else 2

    min_tiles = 1
    if num_tc > 1:
        if M >= 2 * num_tc * sub:
            min_tiles = 2 * num_tc        # ideally 4+ tiles on v7x
        elif M >= num_tc * sub:
            min_tiles = num_tc

    tm = _pick_tm(M, K, N, itemsize, sub, budget, min_tiles, nbuf_guess)
    grid_m = pl.cdiv(M, tm)

    nbuf = 3 if grid_m >= 16 else None                        # None -> library default
    w_buf = 1 if (K * N * itemsize) > (2 << 20) else None     # constant-index weight

    need = ((nbuf or 2) * tm * (K + N) + 2 * K * N) * itemsize + tm * N * 4
    ceiling = max(vmem_cap - (8 << 20), 32 << 20)
    vmem_limit = int(min(max(need + (4 << 20), 32 << 20), ceiling))
    if vmem_limit < need:                 # never undercut the actual working set
        vmem_limit = int(min(need + (2 << 20), vmem_cap))

    out = pl.pallas_call(
        linear_add_kernel,
        out_shape=jax.ShapeDtypeStruct((M, N), x.dtype),
        grid_spec=pltpu.PrefetchScalarGridSpec(
            num_scalar_prefetch=0,
            grid=(grid_m,),
            in_specs=[
                _spec((tm, K), lambda i: (i, 0), nbuf),    # row tile of x
                _spec((K, N), lambda i: (0, 0), w_buf),    # resident weight
            ],
            out_specs=_spec((tm, N), lambda i: (i, 0), nbuf),
        ),
        compiler_params=pltpu.CompilerParams(
            dimension_semantics=("parallel",),
            vmem_limit_bytes=vmem_limit,
        ),
        cost_estimate=pl.CostEstimate(
            flops=2 * M * K * N,
            transcendentals=0,
            bytes_accessed=itemsize * (M * K + K * N + M * N),
        ),
    )(x, wt)
    return out


if __name__ == "__main__":
    # Batch from the spec (x1 = randn(200, 100)); features kept square (100 -> 100)
    # so the fused residual is well-defined. x and the output stay unpadded (100-wide
    # feature dim, full-extent blocks); the weight is transposed once at init.
    M, D = 200, 100

    key = jax.random.PRNGKey(0)
    kx, kw = jax.random.split(key)

    x = jax.random.normal(kx, (M, D), dtype=jnp.float32)

    # Deterministic Linear weight (PyTorch layout (out_features, in_features)),
    # Kaiming-uniform-ish scale ~ U(-1/sqrt(fan_in), 1/sqrt(fan_in)); bias=False.
    bound = 1.0 / math.sqrt(D)
    w = jax.random.uniform(kw, (D, D), dtype=jnp.float32, minval=-bound, maxval=bound)

    wt = prepare_weight(w)            # one-time transpose, outside the per-call path
    jax.block_until_ready(wt)

    out = linear_add(x, wt)
    jax.block_until_ready(out)

    # Reference check in plain JAX (x @ W.T + x).
    ref = x @ w.T + x
    assert out.shape == (M, D)
    assert jnp.allclose(out, ref, atol=1e-4, rtol=1e-4), "mismatch vs reference"

    print("KERNEL_OK")
</pallas_src>

<mosaic_0001>
module attributes {stable_mosaic.version = 11 : i64} {
  func.func @linear_add_kernel(%arg0: i32, %arg1: memref<56x100xf32, #tpu.memory_space<vmem>>, %arg2: memref<100x100xf32, #tpu.memory_space<vmem>>, %arg3: memref<56x100xf32, #tpu.memory_space<vmem>>) attributes {dimension_semantics = [#tpu.dimension_semantics<parallel>], iteration_bounds = array<i64: 4>, scalar_prefetch = 0 : i64, scratch_operands = 0 : i64, tpu.core_type = #tpu.core_type<tc>, window_params = [{transform_indices = @transform_0, window_bounds = array<i64: 56, 100>}, {pipeline_mode = #tpu.pipeline_mode<synchronous>, transform_indices = @transform_1, window_bounds = array<i64: 100, 100>}, {transform_indices = @transform_2, window_bounds = array<i64: 56, 100>}]} {
    %c0 = arith.constant 0 : index
    %c0_0 = arith.constant 0 : index
    %0 = vector.load %arg1[%c0, %c0_0] : memref<56x100xf32, #tpu.memory_space<vmem>>, vector<56x100xf32>
    %c0_1 = arith.constant 0 : index
    %c0_2 = arith.constant 0 : index
    %1 = vector.load %arg2[%c0_1, %c0_2] : memref<100x100xf32, #tpu.memory_space<vmem>>, vector<100x100xf32>
    %cst = arith.constant dense<0.000000e+00> : vector<56x100xf32>
    %2 = tpu.matmul %0, %1, %cst {dimension_numbers = #tpu.dot_dimension_numbers<[1], [0], [0], [1], [0, 0, 1, 1], [], []>} : vector<56x100xf32>, vector<100x100xf32>, vector<56x100xf32> -> vector<56x100xf32>
    %3 = arith.addf %2, %0 : vector<56x100xf32>
    %c0_3 = arith.constant 0 : index
    %c0_4 = arith.constant 0 : index
    %4 = vector.load %arg3[%c0_3, %c0_4] : memref<56x100xf32, #tpu.memory_space<vmem>>, vector<56x100xf32>
    tpu.vector_store %arg3[%c0_3, %c0_4], %3 {strides = array<i32>} : memref<56x100xf32, #tpu.memory_space<vmem>>, vector<56x100xf32>,
    return
  }
  func.func @transform_0(%arg0: i32) -> (i32, i32) {
    %c0_i32 = arith.constant 0 : i32
    %c0_i32_0 = arith.constant 0 : i32
    return %arg0, %c0_i32 : i32, i32
  }
  func.func @transform_1(%arg0: i32) -> (i32, i32) {
    %c0_i32 = arith.constant 0 : i32
    %c0_i32_0 = arith.constant 0 : i32
    %c0_i32_1 = arith.constant 0 : i32
    return %c0_i32, %c0_i32_0 : i32, i32
  }
  func.func @transform_2(%arg0: i32) -> (i32, i32) {
    %c0_i32 = arith.constant 0 : i32
    %c0_i32_0 = arith.constant 0 : i32
    return %arg0, %c0_i32 : i32, i32
  }
}

</mosaic_0001>

<bundles_post_ra>
// kernel: linear_add.1
= control target key start
LH: loop header
LB: loop body
LE: loop exit
PB: predicated region body
PF: predicated region fallthrough
CT: control target
= control target key end

     0   :  { %7 = vsyncpa [#allocation3], 0  ;;  %s1045_s0 = inlined_call_operand.hbm [shape: f32[200,100], index: 0, kind: input, shape index: {}]   ;;  %s1046_s1 = inlined_call_operand.hbm [shape: f32[100,100], index: 1, kind: input, shape index: {}]   ;;  %s1047_s2 = inlined_call_operand.hbm [shape: f32[200,100], index: 2, kind: output, shape index: {}]  }
   0x1   :  { %9 = vsyncpa [#allocation3 + $0x1], 0 }
   0x2   :  { %10 = vsyncpa [#allocation6], 0 }
   0x3   :  { %11 = vsyncpa [#allocation4], 0 }
   0x4   :  { %13 = vsyncpa [#allocation4 + $0x1], 0  ;;  %s778_s9 = smov 0   ;;  %s780_s10 = smov 0  }
   0x5   :  { %s782_s11 = smov 0   ;;  %s784_s12 = smov 0  }
   0x6 LB: > { %s799_s13 = sadd.s32 4294967295, %s750_s12   ;;  %s449_s14 = sadd.s32 4294967294, %s750_s12   ;;  %s750_s12 = sphi %s784_s12, %s1060_s12   ;;  %s746_s11 = sphi %s782_s11, %s1059_s11   ;;  %s742_s10 = sphi %s780_s10, %s1058_s10   ;;  %s738_s9 = sphi %s778_s9, %s1057_s9  }
   0x7   : > { %s803_s15 = sadd.s32 1, %s750_s12   ;;  %s26_s16 = sadd.s32 1, %s746_s11 }
   0x8   : > { %s23_s17 = ssub.s32 %s750_s12, %s803_s15  ;;  %p33_p0 = scmp.ne.s32.totalorder %s746_s11, %s742_s10 }
   0x9   : > { %p24_p1 = scmp.eq.s32.totalorder %s23_s17, 0  ;;  %p34_p2 = scmp.eq.s32.totalorder %s750_s12, 0 }
   0xa   : > { %p39_p3 = scmp.ne.s32.totalorder %s742_s10, %s738_s9  ;;  %p40_p4 = scmp.eq.s32.totalorder %s799_s13, 0 }
   0xb   : > { %s815_s18 = scalar_select %p24_p1, %s746_s11, %s26_s16  }
   0xc   : > { %p817_p5 = por %p34_p2, %p33_p0  ;;  %p823_p6 = por %p40_p4, %p39_p3 }
   0xd   : > { %p84_p7 = scmp.eq.s32.totalorder %s799_s13, 3  ;;  %p90_p8 = scmp.eq.s32.totalorder %s449_s14, 3 }
   0xe   : > { %s1050_s20 = scalar_select %p823_p6, 1, 0 }
   0xf   : > { %p450_p9 = scmp.ge.s32.totalorder %s750_s12, 1  ;;  %p97_p10 = scmp.lt.s32.totalorder %s750_s12, 5 }
  0x10   : > { %p830_p11 = por %p84_p7, %p33_p0  ;;  %p834_p12 = por %p90_p8, %p39_p3 }
  0x11   : > { %p838_p13 = pnand %p450_p9, %p97_p10  ;;  %s752_s24 = smov [#allocation5]  }
  0x12   : > { %s1051_s21 = scalar_select %p830_p11, 1, 0 }
  0x13   : > { %s1052_s22 = scalar_select %p834_p12, 1, 0 }
  0x14   : > { %p578_p1 = pneg %p838_p13  ;;  %s109_s25 = sshll.u32 %s752_s24, 4  ;;  %s110_s25 = int_to_ptr.vmem [resolvable:$true] %s109_s25 }
  0x15   : > { %s641_s26 = scalar_lea.vmem %s110_s25, 1664  ;;  %p649_p8 = scmp.lt.s32.totalorder %s110_s25, %s110_s25 }
  0x16   : > { %p579_p2 = pnand %p578_p1, %p40_p4  ;;  %p642_p7 = scmp.ne.s32.totalorder %s110_s25, %s641_s26 }
  0x17   : > { %p650_p6 = scmp.lt.s32.totalorder %s641_s26, %s641_s26 }
  0x18   : > { %p632_p0 = pneg %p579_p2 }
  0x19   : > { %p651_p12 = por %p650_p6, %p649_p8 }
  0x1a   : > { %p644_p11 = pnand %p642_p7, %p632_p0 }
  0x1c   : > { %p645_p3 = pneg %p644_p11 }
  0x1e   : > { %p652_p9 = pnand %p651_p12, %p645_p3 }
  0x20   : > { %655 = shalt.err (!%p652_p9)
}
  0x21   : > { %s753_s27 = smov 128   ;;  %s754_s28 = smov 8  }
  0x22   : > { %581 = dma.hbm_to_vmem [thread:$0]  (!%p579_p2), %s1046_s1, 1664, %s110_s25, [#allocation6], %s753_s27, %s753_s27, %s754_s28  }
  0x23   : > { %p452_p10 = scmp.ge.s32.totalorder %s750_s12, 4 }
  0x25   : > { %119 = sbr.rel (%p452_p10) target bundleno = 76 (0x4c), region = 20 }
  0x2a   : > { %122 = sbr.rel (!%p817_p5) target bundleno = 76 (0x4c), region = 24  ;;  %s123_s3 = sand.u32 (%p817_p5), 1, %s746_s11  }
  0x2b   : > { %s128_s4 = smul.u32 (%p817_p5), 7, %s750_s12  ;;  %s857_s14 = scalar_lea.sflag (%p817_p5), [#allocation3], %s123_s3 }
  0x2c   : > { %s570_s5 = smul.u32 (%p817_p5), 56, %s123_s3 }
  0x2d   : > { %s129_s6 = ssub.s32 (%p817_p5), 25, %s128_s4 }
  0x2e   : > { %p130_p6 = scmp.lt.s32.totalorder (%p817_p5), %s129_s6, 7  ;;  %s127_s16 = scalar_lea.vmem (%p817_p5), [#allocation2], %s570_s5 }
  0x30   : > { %s1062_s6 = smov (!%p130_p6, %s129_s6), 7 }
  0x31   : > { %s854_s7 = sshll.u32 %s1062_s6, 7 }
  0x32   : > { %s134_s8 = ssub.s32 896, %s854_s7 }
  0x33   : > { %135 = vsyncadd %s857_s14, %s134_s8  ;;  %p454_p5 = scmp.ne.s32.totalorder %s854_s7, 0  ;;  %s475_s17 = smul.u32 896, %s750_s12 }
  0x34   : > { %s140_s19 = sshll.u32 %s127_s16, 4  ;;  %s660_s30 = scalar_lea.hbm %s1045_s0, 3200  ;;  %s867_s19 = int_to_ptr.vmem [resolvable:$true] %s140_s19 }
  0x35   : > { %s865_s26 = scalar_lea.hbm %s1045_s0, %s475_s17 }
  0x36   : > { %s656_s27 = scalar_lea.hbm %s865_s26, %s854_s7  ;;  %p661_p2 = scmp.lt.s32.totalorder %s865_s26, %s1045_s0 }
  0x37   : > { %p657_p11 = scmp.ne.s32.totalorder %s865_s26, %s656_s27  ;;  %p662_p0 = scmp.lt.s32.totalorder %s660_s30, %s656_s27 }
  0x39   : > { %p658_p12 = pnand %p657_p11, %p454_p5  ;;  %p663_p7 = por %p662_p0, %p661_p2 }
  0x3b   : > { %p659_p1 = pneg %p658_p12 }
  0x3d   : > { %p664_p3 = pnand %p663_p7, %p659_p1 }
  0x3f   : > { %667 = shalt.err (!%p664_p3)
}
  0x40   : > { %s668_s5 = scalar_lea.vmem %s867_s19, %s854_s7  ;;  %s755_s6 = smov [#allocation2]  }
  0x41   : > { %p669_p8 = scmp.ne.s32.totalorder %s867_s19, %s668_s5  ;;  %s672_s8 = sshll.u32 %s755_s6, 4  ;;  %s673_s8 = int_to_ptr.vmem [resolvable:$false] %s672_s8 }
  0x42   : > { %s674_s16 = scalar_lea.vmem %s673_s8, 1792  ;;  %p675_p6 = scmp.lt.s32.totalorder %s867_s19, %s673_s8 }
  0x43   : > { %p670_p9 = pnand %p669_p8, %p454_p5  ;;  %p676_p11 = scmp.lt.s32.totalorder %s674_s16, %s668_s5 }
  0x45   : > { %p671_p10 = pneg %p670_p9  ;;  %p677_p12 = por %p676_p11, %p675_p6 }
  0x47   : > { %p678_p2 = pnand %p677_p12, %p671_p10 }
  0x49   : > { %681 = shalt.err (!%p678_p2)
}
  0x4a   : > { %s756_s17 = smov 128   ;;  %s757_s24 = smov 8  }
  0x4b   : > { %146 = dma.hbm_to_vmem [thread:$0]  (%p454_p5), %s865_s26, %s854_s7, %s867_s19, %s857_s14, %s756_s17, %s756_s17, %s757_s24  }
  0x4c PF: > { %152 = sbr.rel (%p838_p13) target bundleno = 347 (0x15b), region = 28  ;;  %s896_s25 = sand.u32 (!%p838_p13), 1, %s742_s10  }
  0x4d   : > { %s571_s27 = smul.u32 (!%p838_p13), 56, %s896_s25  ;;  %s155_s28 = scalar_lea.sflag (!%p838_p13), [#allocation3], %s896_s25 }
  0x4e   : > { %p1054_p1 = scmp.ne.s32.totalorder (!%p838_p13), %s1050_s20, 0 }
  0x4f   : > { %s902_s29 = scalar_lea.vmem (!%p838_p13), [#allocation2], %s571_s27 }
  0x51   : > { %725 = dma.done.wait (%p1054_p1), %s155_s28, 896  }
  0x52   : > { %727 = vsyncadd (%p1054_p1), %s155_s28, 4294966400 }
  0x53   : > { %729 = dma.done.wait (%p40_p4), [#allocation6], 1664  }
  0x54   : > { %731 = vsyncadd (%p40_p4), [#allocation6], 4294965632  ;;  %v758_v0 = vmov 0.0   ;;  %vm759_vm0 = vmmov 0   ;;  %vm235_vm1 = vcmask 1043456   ;;  %v211_v2 = vld [vmem:[#allocation5 + $0x58] sm:$0xff] }
  0x55   : > { %497 = vmatprep.subr.mxu0 %v758_v0  ;;  %544 = vmatprep.subr.mxu1 %v758_v0  ;;  %v212_v1 = vld [vmem:[#allocation5 + $0x60] sm:$0xf]  ;;  %v210_v3 = vld [vmem:[#allocation5 + $0x50] sm:$0xff]  ;;  %v209_v4 = vld [vmem:[#allocation5 + $0x48] sm:$0xff]  ;;  %vm213_vm2 = vcmask 818176   ;;  %s968_s20 = scalar_lea.vmem [#allocation7], %s571_s27 }
  0x56   : > { %523 = vmatprep.mubr.msk.f32.mxu0 %vm759_vm0, %v758_v0  ;;  %535 = vmatprep.mubr.msk.f32.mxu1 %vm759_vm0, %v758_v0  ;;  %v208_v5 = vld [vmem:[#allocation5 + $0x40] sm:$0xff]  ;;  %v207_v6 = vld [vmem:[#allocation5 + $0x38] sm:$0xff]  ;;  %v206_v7 = vld [vmem:[#allocation5 + $0x30] sm:$0xff]  ;;  %s347_s23 = scalar_lea.sflag [#allocation4], %s896_s25  ;;  %p1055_p4 = scmp.ne.s32.totalorder %s1051_s21, 0 }
  0x57   : > { %498 = vmatpush3.msk.msra.mxu0 %vm235_vm1, %v212_v1  ;;  %557 = vmatpush3.msk.msra.mxu1 %vm235_vm1, %v212_v1  ;;  %v205_v8 = vld [vmem:[#allocation5 + $0x28] sm:$0xff]  ;;  %v204_v9 = vld [vmem:[#allocation5 + $0x20] sm:$0xff]  ;;  %v203_v10 = vld [vmem:[#allocation5 + $0x18] sm:$0xff]  ;;  %s354_s7 = smul.u32 (%p1055_p4), 7, %s799_s13 }
  0x58   : > { %499 = vmatprep.subr.mxu0 %v758_v0  ;;  %545 = vmatprep.subr.mxu1 %v758_v0  ;;  %v202_v11 = vld [vmem:[#allocation5 + $0x10] sm:$0xff]  ;;  %v201_v12 = vld [vmem:[#allocation5 + $0x8] sm:$0xff]  ;;  %v200_v13 = vld [vmem:[#allocation5] sm:$0xff] }
  0x59   : > { %500 = vmatpush3.msra.mxu0 %v211_v2  ;;  %558 = vmatpush3.msra.mxu1 %v211_v2  ;;  %v193_v14 = vld [vmem:[%s902_s29] sm:$0xff]  ;;  %v194_v16 = vld [vmem:[%s902_s29 + $0x8] sm:$0xff]  ;;  %v195_v18 = vld [vmem:[%s902_s29 + $0x10] sm:$0xff]  ;;  %s355_s14 = ssub.s32 (%p1055_p4), 25, %s354_s7 }
  0x5a   : > { %501 = vmatprep.subr.mxu0 %v758_v0  ;;  %546 = vmatprep.subr.mxu1 %v758_v0  ;;  %v197_v15 = vld [vmem:[%s902_s29 + $0x20] sm:$0xff]  ;;  %v198_v17 = vld [vmem:[%s902_s29 + $0x28] sm:$0xff]  ;;  %v199_v19 = vld [vmem:[%s902_s29 + $0x30] sm:$0xff]  ;;  %p356_p13 = scmp.lt.s32.totalorder (%p1055_p4), %s355_s14, 7 }
  0x5b   : > { %502 = vmatpush3.msra.mxu0 %v210_v3  ;;  %559 = vmatpush3.msra.mxu1 %v210_v3  ;;  %v196_v20 = vld [vmem:[%s902_s29 + $0x18] sm:$0xff] }
  0x5c   : > { %503 = vmatprep.subr.mxu0 %v758_v0  ;;  %547 = vmatprep.subr.mxu1 %v758_v0 }
  0x5d   : > { %504 = vmatpush3.msra.mxu0 %v209_v4  ;;  %560 = vmatpush3.msra.mxu1 %v209_v4 }
  0x5e   : > { %505 = vmatprep.subr.mxu0 %v758_v0  ;;  %548 = vmatprep.subr.mxu1 %v758_v0 }
  0x5f   : > { %506 = vmatpush3.msra.mxu0 %v208_v5  ;;  %561 = vmatpush3.msra.mxu1 %v208_v5 }
  0x60   : > { %507 = vmatprep.subr.mxu0 %v758_v0  ;;  %549 = vmatprep.subr.mxu1 %v758_v0 }
  0x61   : > { %508 = vmatpush3.msra.mxu0 %v207_v6  ;;  %562 = vmatpush3.msra.mxu1 %v207_v6 }
  0x62   : > { %509 = vmatprep.subr.mxu0 %v758_v0  ;;  %550 = vmatprep.subr.mxu1 %v758_v0 }
  0x63   : > { %510 = vmatpush3.msra.mxu0 %v206_v7  ;;  %563 = vmatpush3.msra.mxu1 %v206_v7 }
  0x64   : > { %511 = vmatprep.subr.mxu0 %v758_v0  ;;  %551 = vmatprep.subr.mxu1 %v758_v0 }
  0x65   : > { %512 = vmatpush3.msra.mxu0 %v205_v8  ;;  %564 = vmatpush3.msra.mxu1 %v205_v8 }
  0x66   : > { %513 = vmatprep.subr.mxu0 %v758_v0  ;;  %552 = vmatprep.subr.mxu1 %v758_v0 }
  0x67   : > { %514 = vmatpush3.msra.mxu0 %v204_v9  ;;  %565 = vmatpush3.msra.mxu1 %v204_v9 }
  0x68   : > { %515 = vmatprep.subr.mxu0 %v758_v0  ;;  %553 = vmatprep.subr.mxu1 %v758_v0 }
  0x69   : > { %516 = vmatpush3.msra.mxu0 %v203_v10  ;;  %566 = vmatpush3.msra.mxu1 %v203_v10 }
  0x6a   : > { %517 = vmatprep.subr.mxu0 %v758_v0  ;;  %554 = vmatprep.subr.mxu1 %v758_v0 }
  0x6b   : > { %518 = vmatpush3.msra.mxu0 %v202_v11  ;;  %567 = vmatpush3.msra.mxu1 %v202_v11 }
  0x6c   : > { %519 = vmatprep.subr.mxu0 %v758_v0  ;;  %555 = vmatprep.subr.mxu1 %v758_v0 }
  0x6d   : > { %520 = vmatpush3.msra.mxu0 %v201_v12  ;;  %568 = vmatpush3.msra.mxu1 %v201_v12 }
  0x6e   : > { %521 = vmatprep.subr.mxu0 %v758_v0  ;;  %556 = vmatprep.subr.mxu1 %v758_v0 }
  0x6f   : > { %522 = vmatpush3.msra.mxu0 %v200_v13  ;;  %569 = vmatpush3.msra.mxu1 %v200_v13 }
  0x70   : > { %524 = vmatmul.mubr.msk.f32.vlgmr.msra.gmra.mxu0 %vm213_vm2, %v193_v14  ;;  %536 = vmatmul.mubr.msk.f32.vlgmr.msra.gmra.mxu1 %vm213_vm2, %v197_v15 }
  0x71   : > { %526 = vmatprep.mubr.msk.f32.mxu0 %vm759_vm0, %v758_v0  ;;  %538 = vmatprep.mubr.msk.f32.mxu1 %vm759_vm0, %v758_v0 }
  0x74   : > { %527 = vmatmul.mubr.msk.f32.gmra.mxu0 %vm213_vm2, %v194_v16  ;;  %539 = vmatmul.mubr.msk.f32.gmra.mxu1 %vm213_vm2, %v198_v17 }
  0x75   : > { %529 = vmatprep.mubr.msk.f32.mxu0 %vm759_vm0, %v758_v0  ;;  %541 = vmatprep.mubr.msk.f32.mxu1 %vm759_vm0, %v758_v0 }
  0x78   : > { %530 = vmatmul.mubr.msk.f32.gmra.mxu0 %vm213_vm2, %v195_v18  ;;  %542 = vmatmul.mubr.msk.f32.gmra.mxu1 %vm213_vm2, %v199_v19 }
  0x79   : > { %532 = vmatprep.mubr.msk.f32.mxu0 %vm759_vm0, %v758_v0 }
  0x7c   : > { %533 = vmatmul.mubr.msk.f32.gmra.mxu0 %vm213_vm2, %v196_v20 }
 0x130   : > { %v305_v21 = vpop.f32.mrf.mxu0  ;;  %v325_v22 = vpop.f32.mrf.mxu1 }
 0x131   : > { %v306_v23 = vadd.f32 %v305_v21, %v193_v14  ;;  %v326_v24 = vadd.f32 %v325_v22, %v197_v15 }
 0x132   : > { %v525_v25 = vpop.f32.mrf.mxu0  ;;  %v537_v26 = vpop.f32.mrf.mxu1 }
 0x133   : > { %339 = vst.msk [vmem:[%s968_s20] sm:$0xff] %vm213_vm2, %v306_v23  ;;  %343 = vst.msk [vmem:[%s968_s20 + $0x20] sm:$0xff] %vm213_vm2, %v326_v24 }
 0x134   : > { %v310_v27 = vpop.f32.mrf.mxu0  ;;  %v330_v28 = vpop.f32.mrf.mxu1 }
 0x135   : > { %v311_v29 = vadd.f32 %v310_v27, %v194_v16  ;;  %v331_v30 = vadd.f32 %v330_v28, %v198_v17 }
 0x136   : > { %v528_v31 = vpop.f32.mrf.mxu0  ;;  %v540_v32 = vpop.f32.mrf.mxu1 }
 0x137   : > { %340 = vst.msk [vmem:[%s968_s20 + $0x8] sm:$0xff] %vm213_vm2, %v311_v29  ;;  %344 = vst.msk [vmem:[%s968_s20 + $0x28] sm:$0xff] %vm213_vm2, %v331_v30 }
 0x138   : > { %v315_v33 = vpop.f32.mrf.mxu0  ;;  %v335_v34 = vpop.f32.mrf.mxu1 }
 0x139   : > { %v316_v35 = vadd.f32 %v315_v33, %v195_v18  ;;  %v336_v36 = vadd.f32 %v335_v34, %v199_v19 }
 0x13a   : > { %v531_v37 = vpop.f32.mrf.mxu0  ;;  %v543_v38 = vpop.f32.mrf.mxu1 }
 0x13b   : > { %341 = vst.msk [vmem:[%s968_s20 + $0x10] sm:$0xff] %vm213_vm2, %v316_v35  ;;  %345 = vst.msk [vmem:[%s968_s20 + $0x30] sm:$0xff] %vm213_vm2, %v336_v36  ;;  %353 = sbr.rel (!%p1055_p4) target bundleno = 347 (0x15b), region = 40 }
 0x13c   : > { %v320_v39 = vpop.f32.mrf.mxu0 }
 0x13d   : > { %v321_v40 = vadd.f32 %v320_v39, %v196_v20 }
 0x13e   : > { %v534_v41 = vpop.f32.mrf.mxu0 }
 0x13f   : > { %342 = vst.msk [vmem:[%s968_s20 + $0x18] sm:$0xff] %vm213_vm2, %v321_v40 }
 0x140   : > { %s1064_s14 = smov (!%p356_p13, %s355_s14), 7 }
 0x141   : > { %s988_s19 = sshll.u32 %s1064_s14, 7 }
 0x142   : > { %s360_s26 = ssub.s32 896, %s988_s19 }
 0x143   : > { %361 = vsyncadd %s347_s23, %s360_s26  ;;  %p469_p5 = scmp.ne.s32.totalorder %s988_s19, 0  ;;  %s476_s21 = smul.u32 896, %s799_s13 }
 0x144   : > { %s366_s30 = sshll.u32 %s968_s20, 4  ;;  %s760_s8 = smov [#allocation7]   ;;  %s1001_s30 = int_to_ptr.vmem [resolvable:$true] %s366_s30 }
 0x145   : > { %s999_s5 = scalar_lea.hbm %s1047_s2, %s476_s21  ;;  %s682_s6 = scalar_lea.vmem %s1001_s30, %s988_s19 }
 0x146   : > { %p683_p0 = scmp.ne.s32.totalorder %s1001_s30, %s682_s6  ;;  %s686_s16 = sshll.u32 %s760_s8, 4  ;;  %s687_s16 = int_to_ptr.vmem [resolvable:$false] %s686_s16 }
 0x147   : > { %s688_s13 = scalar_lea.vmem %s687_s16, 1792  ;;  %p689_p8 = scmp.lt.s32.totalorder %s1001_s30, %s687_s16 }
 0x148   : > { %p684_p7 = pnand %p683_p0, %p469_p5  ;;  %p690_p9 = scmp.lt.s32.totalorder %s688_s13, %s682_s6 }
 0x14a   : > { %p685_p3 = pneg %p684_p7  ;;  %p691_p10 = por %p690_p9, %p689_p8 }
 0x14c   : > { %p692_p6 = pnand %p691_p10, %p685_p3 }
 0x14e   : > { %695 = shalt.err (!%p692_p6)
}
 0x14f   : > { %s696_s17 = scalar_lea.hbm %s999_s5, %s988_s19  ;;  %s700_s28 = scalar_lea.hbm %s1047_s2, 3200 }
 0x150   : > { %p697_p11 = scmp.ne.s32.totalorder %s999_s5, %s696_s17  ;;  %p701_p1 = scmp.lt.s32.totalorder %s999_s5, %s1047_s2 }
 0x151   : > { %p702_p4 = scmp.lt.s32.totalorder %s700_s28, %s696_s17 }
 0x152   : > { %p698_p12 = pnand %p697_p11, %p469_p5 }
 0x153   : > { %p703_p13 = por %p702_p4, %p701_p1 }
 0x154   : > { %p699_p2 = pneg %p698_p12 }
 0x156   : > { %p704_p0 = pnand %p703_p13, %p699_p2 }
 0x158   : > { %707 = shalt.err (!%p704_p0)
}
 0x159   : > { %s761_s7 = smov 128   ;;  %s762_s14 = smov 8  }
 0x15a   : > { %372 = dma.vmem_to_hbm [thread:$0]  (%p469_p5), %s1001_s30, %s988_s19, %s999_s5, %s347_s23, %s761_s7, %s761_s7, %s762_s14  }
 0x15b PF: > { %p588_p7 = scmp.ge.s32.totalorder %s750_s12, 2  ;;  %s381_s26 = sand.u32 1, %s738_s9  }
 0x15c   : > { %p1056_p3 = scmp.ne.s32.totalorder %s1052_s22, 0  ;;  %s382_s21 = scalar_lea.sflag [#allocation4], %s381_s26 }
 0x15e   : > { %p583_p8 = pnand %p588_p7, %p1056_p3 }
 0x160   : > { %p584_p9 = pneg %p583_p8 }
 0x162   : > { %733 = dma.done.wait (%p584_p9), %s382_s21, 896  }
 0x163   : > { %735 = vsyncadd (%p584_p9), %s382_s21, 4294966400  ;;  %p16_p10 = scmp.ge.s32.totalorder %s803_s15, 6   ;;  %s1057_s9 = smov %s742_s10 }
 0x164   : > { %s1058_s10 = smov %s746_s11  ;;  %s1059_s11 = smov %s815_s18 }
 0x165   : > { %s1060_s12 = smov %s803_s15  ;;  %18 = sbr.rel (!%p16_p10) target bundleno = 6 (0x6), region = 77 }
 0x16a   :  { %387 = vsyncpa [#allocation3], 1 }
 0x16b   :  { %389 = vsyncpa [#allocation3 + $0x1], 1 }
 0x16c   :  { %390 = vsyncpa [#allocation6], 1 }
 0x16d   :  { %391 = vsyncpa [#allocation4], 1 }
 0x16e   :  { %393 = vsyncpa [#allocation4 + $0x1], 1 }

</bundles_post_ra>
